<compile_context>
chip_gen: v7x
topology: tpu7x:2x2x1
jax: 0.10.0
libtpu: 0.0.40
codegen_flags: <defaults>
</compile_context>

<pallas_src>
import jax
import jax.numpy as jnp
from jax.experimental import pallas as pl
from jax.experimental.pallas import tpu as pltpu

NUM_BATTLEFIELDS = 10
HIDDEN = 128
LANE = 128  # TPU lane width


def policy_kernel(x_ref, w1_ref, b1_ref, w2_ref, b2_ref, out_ref):
    # x_ref : (TB, F)   bf16   batch tile
    # w1_ref: (F, H)    bf16   resident across grid
    # b1_ref: (1, H)    f32    resident
    # w2_ref: (H, LANE) bf16   resident; columns F..LANE-1 are zero
    # b2_ref: (1, LANE) f32    resident; columns F..LANE-1 are -inf
    # out_ref:(TB, F)   f32
    F = out_ref.shape[1]

    # fc1 + ReLU: bf16 MXU matmul with f32 accumulation; bias/ReLU in f32.
    h = jnp.dot(x_ref[...], w1_ref[...], preferred_element_type=jnp.float32)
    h = jnp.maximum(h + b1_ref[...], 0.0)

    # fc2, lane-dense: padded output columns have zero weight and -inf bias,
    # so they contribute exp(-inf) = 0 to the softmax denominator.
    logits = jnp.dot(h.astype(w2_ref.dtype), w2_ref[...],
                     preferred_element_type=jnp.float32) + b2_ref[...]

    # Numerically stable softmax over the full 128-lane vreg, scaled by 100.
    m = jnp.max(logits, axis=-1, keepdims=True)
    e = jnp.exp(logits - m)
    denom = jnp.sum(e, axis=-1, keepdims=True)
    probs = e * pl.reciprocal(denom, approx=True)  # EUP vrcp, ~1e-4 rel. error

    out_ref[...] = (probs[:, :F] * 100.0).astype(out_ref.dtype)


def policy_network_forward(x, w1, b1, w2, b2, *, block_batch=512):
    """x: (B, F) float32; w1: (F, H); b1: (1, H); w2: (H, F); b2: (1, F).

    Weights are stored pre-transposed (in_features, out_features), matching
    PyTorch's x @ W.T + b.  Returns (B, F) float32.
    """
    B, F = x.shape
    H = w1.shape[1]
    assert w1.shape == (F, H) and b1.shape == (1, H)
    assert w2.shape == (H, F) and b2.shape == (1, F)

    # ---- wrapper-side weight prep (done once, outside the grid loop) ----
    out_pad = -(-F // LANE) * LANE  # round F up to a full lane width (128)
    w2p = jnp.zeros((H, out_pad), jnp.float32).at[:, :F].set(w2)
    b2p = jnp.full((1, out_pad), -jnp.inf, jnp.float32).at[:, :F].set(
        b2.astype(jnp.float32))

    # bf16 MXU operands (f32 accumulation in-kernel); biases stay f32.
    xb = x.astype(jnp.bfloat16)
    w1b = w1.astype(jnp.bfloat16)
    w2b = w2p.astype(jnp.bfloat16)
    b1f = b1.astype(jnp.float32)

    # ---- batch tiling ----
    # Cap TB so the (TB, 128) f32 hidden/logits tiles stay small even on v7x
    # (64 MiB physical / 32 MiB default scoped VMEM).
    block_batch = min(block_batch, 1024)
    if B <= block_batch:
        TB = B           # block == full array dims: always a legal block shape
        Bp = B
    else:
        TB = block_batch  # multiple of 8
        Bp = -(-B // TB) * TB
        if Bp != B:
            xb = jnp.pad(xb, ((0, Bp - B), (0, 0)))  # padded rows sliced off below

    out = pl.pallas_call(
        policy_kernel,
        out_shape=jax.ShapeDtypeStruct((Bp, F), jnp.float32),
        grid=(Bp // TB,),
        in_specs=[
            pl.BlockSpec((TB, F), lambda i: (i, 0)),        # x tile, pipelined
            pl.BlockSpec((F, H), lambda i: (0, 0)),         # w1, resident
            pl.BlockSpec((1, H), lambda i: (0, 0)),         # b1, resident
            pl.BlockSpec((H, out_pad), lambda i: (0, 0)),   # w2 (padded), resident
            pl.BlockSpec((1, out_pad), lambda i: (0, 0)),   # b2 (padded), resident
        ],
        out_specs=pl.BlockSpec((TB, F), lambda i: (i, 0)),
        compiler_params=pltpu.CompilerParams(
            dimension_semantics=("parallel",)  # megacore-shardable batch axis
        ),
    )(xb, w1b, b1f, w2b, b2p)

    return out[:B]


def init_params(key, num_battlefields=NUM_BATTLEFIELDS, hidden=HIDDEN):
    """Deterministic synthetic init (uniform, roughly matching nn.Linear scale)."""
    k1, k2, k3, k4 = jax.random.split(key, 4)
    bound1 = 1.0 / jnp.sqrt(num_battlefields)
    bound2 = 1.0 / jnp.sqrt(hidden)
    # stored pre-transposed: (in, out)
    w1 = jax.random.uniform(k1, (num_battlefields, hidden), jnp.float32, -bound1, bound1)
    b1 = jax.random.uniform(k2, (1, hidden), jnp.float32, -bound1, bound1)
    w2 = jax.random.uniform(k3, (hidden, num_battlefields), jnp.float32, -bound2, bound2)
    b2 = jax.random.uniform(k4, (1, num_battlefields), jnp.float32, -bound2, bound2)
    return w1, b1, w2, b2


def reference_forward(x, w1, b1, w2, b2):
    """Pure-JAX reference with the same precision choices as the kernel."""
    h = jnp.dot(x.astype(jnp.bfloat16), w1.astype(jnp.bfloat16),
                preferred_element_type=jnp.float32) + b1
    h = jnp.maximum(h, 0.0)
    logits = jnp.dot(h.astype(jnp.bfloat16), w2.astype(jnp.bfloat16),
                     preferred_element_type=jnp.float32) + b2
    return jax.nn.softmax(logits, axis=-1) * 100.0


if __name__ == "__main__":
    key = jax.random.PRNGKey(0)
    kx, kp = jax.random.split(key)
    w1, b1, w2, b2 = init_params(kp)

    # small batch (single tile path)
    batch = 8
    x = jax.random.uniform(kx, (batch, NUM_BATTLEFIELDS), jnp.float32, 0.0, 100.0)
    out = jax.block_until_ready(policy_network_forward(x, w1, b1, w2, b2))
    ref = reference_forward(x, w1, b1, w2, b2)
    assert out.shape == (batch, NUM_BATTLEFIELDS)
    # approx reciprocal + bf16 MXU operands -> slightly looser tolerance on a
    # 100-scaled softmax
    assert jnp.allclose(out, ref, atol=0.1, rtol=1e-2), "mismatch vs reference (small batch)"
    assert jnp.allclose(jnp.sum(out, axis=-1), 100.0, atol=0.5)

    # larger, non-multiple batch (exercises the tiled grid + padding path)
    batch2 = 1000
    x2 = jax.random.uniform(kx, (batch2, NUM_BATTLEFIELDS), jnp.float32, 0.0, 100.0)
    out2 = jax.block_until_ready(
        policy_network_forward(x2, w1, b1, w2, b2, block_batch=256))
    ref2 = reference_forward(x2, w1, b1, w2, b2)
    assert out2.shape == (batch2, NUM_BATTLEFIELDS)
    assert jnp.allclose(out2, ref2, atol=0.1, rtol=1e-2), "mismatch vs reference (tiled batch)"
    assert jnp.allclose(jnp.sum(out2, axis=-1), 100.0, atol=0.5)

    print("KERNEL_OK")
</pallas_src>

<mosaic_0001>
module attributes {stable_mosaic.version = 11 : i64} {
  func.func @policy_kernel(%arg0: i32, %arg1: memref<8x10xbf16, #tpu.memory_space<vmem>>, %arg2: memref<10x128xbf16, #tpu.memory_space<vmem>>, %arg3: memref<1x128xf32, #tpu.memory_space<vmem>>, %arg4: memref<128x128xbf16, #tpu.memory_space<vmem>>, %arg5: memref<1x128xf32, #tpu.memory_space<vmem>>, %arg6: memref<8x10xf32, #tpu.memory_space<vmem>>) attributes {dimension_semantics = [#tpu.dimension_semantics<parallel>], iteration_bounds = array<i64: 1>, scalar_prefetch = 0 : i64, scratch_operands = 0 : i64, tpu.core_type = #tpu.core_type<tc>, window_params = [{transform_indices = @transform_0, window_bounds = array<i64: 8, 10>}, {pipeline_mode = #tpu.pipeline_mode<synchronous>, transform_indices = @transform_1, window_bounds = array<i64: 10, 128>}, {pipeline_mode = #tpu.pipeline_mode<synchronous>, transform_indices = @transform_2, window_bounds = array<i64: 1, 128>}, {pipeline_mode = #tpu.pipeline_mode<synchronous>, transform_indices = @transform_3, window_bounds = array<i64: 128, 128>}, {pipeline_mode = #tpu.pipeline_mode<synchronous>, transform_indices = @transform_4, window_bounds = array<i64: 1, 128>}, {transform_indices = @transform_5, window_bounds = array<i64: 8, 10>}]} {
    %c0 = arith.constant 0 : index
    %c0_0 = arith.constant 0 : index
    %0 = vector.load %arg1[%c0, %c0_0] : memref<8x10xbf16, #tpu.memory_space<vmem>>, vector<8x10xbf16>
    %c0_1 = arith.constant 0 : index
    %c0_2 = arith.constant 0 : index
    %1 = vector.load %arg2[%c0_1, %c0_2] : memref<10x128xbf16, #tpu.memory_space<vmem>>, vector<10x128xbf16>
    %cst = arith.constant dense<0.000000e+00> : vector<8x128xf32>
    %2 = tpu.matmul %0, %1, %cst {dimension_numbers = #tpu.dot_dimension_numbers<[1], [0], [0], [1], [0, 0, 1, 1], [], []>} : vector<8x10xbf16>, vector<10x128xbf16>, vector<8x128xf32> -> vector<8x128xf32>
    %c0_3 = arith.constant 0 : index
    %c0_4 = arith.constant 0 : index
    %3 = vector.load %arg3[%c0_3, %c0_4] : memref<1x128xf32, #tpu.memory_space<vmem>>, vector<1x128xf32>
    %4 = vector.broadcast %3 : vector<1x128xf32> to vector<8x128xf32>
    %5 = arith.addf %2, %4 : vector<8x128xf32>
    %cst_5 = arith.constant 0.000000e+00 : f32
    %6 = vector.broadcast %cst_5 : f32 to vector<8x128xf32>
    %7 = arith.maximumf %5, %6 : vector<8x128xf32>
    %8 = arith.truncf %7 : vector<8x128xf32> to vector<8x128xbf16>
    %c0_6 = arith.constant 0 : index
    %c0_7 = arith.constant 0 : index
    %9 = vector.load %arg4[%c0_6, %c0_7] : memref<128x128xbf16, #tpu.memory_space<vmem>>, vector<128x128xbf16>
    %cst_8 = arith.constant dense<0.000000e+00> : vector<8x128xf32>
    %10 = tpu.matmul %8, %9, %cst_8 {dimension_numbers = #tpu.dot_dimension_numbers<[1], [0], [0], [1], [0, 0, 1, 1], [], []>} : vector<8x128xbf16>, vector<128x128xbf16>, vector<8x128xf32> -> vector<8x128xf32>
    %c0_9 = arith.constant 0 : index
    %c0_10 = arith.constant 0 : index
    %11 = vector.load %arg5[%c0_9, %c0_10] : memref<1x128xf32, #tpu.memory_space<vmem>>, vector<1x128xf32>
    %12 = vector.broadcast %11 : vector<1x128xf32> to vector<8x128xf32>
    %13 = arith.addf %10, %12 : vector<8x128xf32>
    %cst_11 = arith.constant dense<0xFF800000> : vector<8xf32>
    %14 = vector.multi_reduction <maximumf>, %13, %cst_11 [1] : vector<8x128xf32> to vector<8xf32>
    %15 = vector.shape_cast %14 : vector<8xf32> to vector<8x1xf32>
    %16 = vector.broadcast %15 : vector<8x1xf32> to vector<8x128xf32>
    %17 = arith.subf %13, %16 : vector<8x128xf32>
    %18 = math.exp %17 : vector<8x128xf32>
    %cst_12 = arith.constant dense<0.000000e+00> : vector<8xf32>
    %19 = vector.multi_reduction <add>, %18, %cst_12 [1] : vector<8x128xf32> to vector<8xf32>
    %20 = vector.shape_cast %19 : vector<8xf32> to vector<8x1xf32>
    %21 = tpu.reciprocal %20 {approx = true} : vector<8x1xf32> -> vector<8x1xf32>
    %22 = vector.broadcast %21 : vector<8x1xf32> to vector<8x128xf32>
    %23 = arith.mulf %18, %22 : vector<8x128xf32>
    %24 = vector.extract_strided_slice %23 {offsets = [0, 0], sizes = [8, 10], strides = [1, 1]} : vector<8x128xf32> to vector<8x10xf32>
    %cst_13 = arith.constant 1.000000e+02 : f32
    %25 = vector.broadcast %cst_13 : f32 to vector<8x10xf32>
    %26 = arith.mulf %24, %25 : vector<8x10xf32>
    %c0_14 = arith.constant 0 : index
    %c0_15 = arith.constant 0 : index
    %27 = vector.load %arg6[%c0_14, %c0_15] : memref<8x10xf32, #tpu.memory_space<vmem>>, vector<8x10xf32>
    tpu.vector_store %arg6[%c0_14, %c0_15], %26 {strides = array<i32>} : memref<8x10xf32, #tpu.memory_space<vmem>>, vector<8x10xf32>,
    return
  }
  func.func @transform_0(%arg0: i32) -> (i32, i32) {
    %c0_i32 = arith.constant 0 : i32
    %c0_i32_0 = arith.constant 0 : i32
    return %arg0, %c0_i32 : i32, i32
  }
  func.func @transform_1(%arg0: i32) -> (i32, i32) {
    %c0_i32 = arith.constant 0 : i32
    %c0_i32_0 = arith.constant 0 : i32
    %c0_i32_1 = arith.constant 0 : i32
    return %c0_i32, %c0_i32_0 : i32, i32
  }
  func.func @transform_2(%arg0: i32) -> (i32, i32) {
    %c0_i32 = arith.constant 0 : i32
    %c0_i32_0 = arith.constant 0 : i32
    %c0_i32_1 = arith.constant 0 : i32
    return %c0_i32, %c0_i32_0 : i32, i32
  }
  func.func @transform_3(%arg0: i32) -> (i32, i32) {
    %c0_i32 = arith.constant 0 : i32
    %c0_i32_0 = arith.constant 0 : i32
    %c0_i32_1 = arith.constant 0 : i32
    return %c0_i32, %c0_i32_0 : i32, i32
  }
  func.func @transform_4(%arg0: i32) -> (i32, i32) {
    %c0_i32 = arith.constant 0 : i32
    %c0_i32_0 = arith.constant 0 : i32
    %c0_i32_1 = arith.constant 0 : i32
    return %c0_i32, %c0_i32_0 : i32, i32
  }
  func.func @transform_5(%arg0: i32) -> (i32, i32) {
    %c0_i32 = arith.constant 0 : i32
    %c0_i32_0 = arith.constant 0 : i32
    return %arg0, %c0_i32 : i32, i32
  }
}

</mosaic_0001>

<bundles_post_ra>
// kernel: tpu_custom_call.1
= control target key start
LH: loop header
LB: loop body
LE: loop exit
PB: predicated region body
PF: predicated region fallthrough
CT: control target
= control target key end

     0   :  { %10 = vsyncpa [#allocation3], 0  ;;  %s528_s0 = inlined_call_operand.hbm [shape: bf16[8,10], index: 0, kind: input, shape index: {}]   ;;  %s529_s1 = inlined_call_operand.hbm [shape: bf16[10,128], index: 1, kind: input, shape index: {}]   ;;  %s530_s2 = inlined_call_operand.vmem [shape: f32[1,128], index: 2, kind: input, shape index: {}]   ;;  %s531_s3 = inlined_call_operand.hbm [shape: bf16[128,128], index: 3, kind: input, shape index: {}]   ;;  %s532_s4 = inlined_call_operand.vmem [shape: f32[1,128], index: 4, kind: input, shape index: {}]   ;;  %s533_s5 = inlined_call_operand.hbm [shape: f32[8,10], index: 5, kind: output, shape index: {}]  }
   0x1   :  { %11 = vsyncpa [#allocation6], 0 }
   0x2   :  { %12 = vsyncpa [#allocation4], 0  ;;  %s428_s18 = smov [#allocation5]   ;;  %s334_s22 = scalar_lea.hbm %s529_s1, 128 }
   0x3   :  { %s28_s19 = sshll.u32 %s428_s18, 4  ;;  %p335_p0 = scmp.ne.s32.totalorder %s529_s1, %s334_s22  ;;  %s29_s19 = int_to_ptr.vmem [resolvable:$true] %s28_s19 }
   0x4   :  { %p338_p1 = scmp.lt.u32.totalorder %s334_s22, %s529_s1 }
   0x6   :  { %p340_p2 = pnand %p338_p1, %p335_p0 }
   0x8   :  { %343 = shalt.err (!%p340_p2)
}
   0x9   :  { %s344_s27 = scalar_lea.vmem %s29_s19, 128  ;;  %p349_p4 = scmp.lt.s32.totalorder %s29_s19, %s29_s19 }
   0xa   :  { %p345_p3 = scmp.ne.s32.totalorder %s29_s19, %s344_s27  ;;  %p350_p5 = scmp.lt.s32.totalorder %s344_s27, %s344_s27 }
   0xc   :  { %p351_p6 = por %p350_p5, %p349_p4 }
   0xe   :  { %p352_p7 = pnand %p351_p6, %p345_p3 }
  0x10   :  { %355 = shalt.err (!%p352_p7)
}
  0x11   :  { %s429_s28 = smov 64   ;;  %s430_s29 = smov 4  }
  0x12   :  { %34 = dma.hbm_to_vmem [thread:$0]  %s529_s1, 128, %s29_s19, [#allocation6], %s429_s28, %s429_s28, %s430_s29  }
  0x13   :  { %s431_s7 = smov [#allocation2]   ;;  %s432_s9 = smov [#allocation7]  }
  0x14   :  { %s19_s8 = sshll.u32 %s431_s7, 4  ;;  %s42_s10 = sshll.u32 %s432_s9, 4  ;;  %s20_s8 = int_to_ptr.vmem [resolvable:$true] %s19_s8  ;;  %s43_s10 = int_to_ptr.vmem [resolvable:$true] %s42_s10 }
  0x15   :  { %s356_s13 = scalar_lea.hbm %s528_s0, 64 }
  0x16   :  { %p357_p8 = scmp.ne.s32.totalorder %s528_s0, %s356_s13  ;;  %p360_p9 = scmp.lt.u32.totalorder %s356_s13, %s528_s0 }
  0x18   :  { %p362_p10 = pnand %p360_p9, %p357_p8 }
  0x1a   :  { %365 = shalt.err (!%p362_p10)
}
  0x1b   :  { %s366_s1 = scalar_lea.vmem %s20_s8, 64  ;;  %p371_p12 = scmp.lt.s32.totalorder %s20_s8, %s20_s8 }
  0x1c   :  { %p367_p11 = scmp.ne.s32.totalorder %s20_s8, %s366_s1  ;;  %p372_p13 = scmp.lt.s32.totalorder %s366_s1, %s366_s1 }
  0x1e   :  { %p373_p0 = por %p372_p13, %p371_p12 }
  0x20   :  { %p374_p1 = pnand %p373_p0, %p367_p11 }
  0x22   :  { %377 = shalt.err (!%p374_p1)
}
  0x23   :  { %22 = dma.hbm_to_vmem [thread:$0]  %s528_s0, 64, %s20_s8, [#allocation3]  }
  0x24   :  { %s378_s22 = scalar_lea.hbm %s531_s3, 1024 }
  0x25   :  { %p379_p2 = scmp.ne.s32.totalorder %s531_s3, %s378_s22  ;;  %p382_p3 = scmp.lt.u32.totalorder %s378_s22, %s531_s3 }
  0x27   :  { %p384_p4 = pnand %p382_p3, %p379_p2 }
  0x29   :  { %387 = shalt.err (!%p384_p4)
}
  0x2a   :  { %s388_s27 = scalar_lea.vmem %s43_s10, 1024  ;;  %p393_p6 = scmp.lt.s32.totalorder %s43_s10, %s43_s10 }
  0x2b   :  { %p389_p5 = scmp.ne.s32.totalorder %s43_s10, %s388_s27  ;;  %p394_p7 = scmp.lt.s32.totalorder %s388_s27, %s388_s27 }
  0x2d   :  { %p395_p8 = por %p394_p7, %p393_p6 }
  0x2f   :  { %p396_p9 = pnand %p395_p8, %p389_p5 }
  0x31   :  { %399 = shalt.err (!%p396_p9)
}
  0x32   :  { %48 = dma.hbm_to_vmem [thread:$0]  %s531_s3, 1024, %s43_s10, [#allocation6], %s429_s28, %s429_s28, %s430_s29  }
  0x33   :  { %422 = dma.done.wait [#allocation3], 64  }
  0x34   :  { %423 = vsyncadd [#allocation3], 4294967232 }
  0x35   :  { %424 = dma.done.wait [#allocation6], 1152  }
  0x36   :  { %425 = vsyncadd [#allocation6], 4294966144  ;;  %v433_v0 = vmov 0.0   ;;  %vm434_vm0 = vmmov 0   ;;  %vm80_vm1 = vcmask 1044480   ;;  %vm76_vm2 = vcmask 80896  }
  0x37   :  { %287 = vmatprep.subr.bf16.mxu0 %v433_v0  ;;  %289 = vmatprep.mubr.msk.bf16.mxu0 %vm434_vm0, %v433_v0  ;;  %v321_v1 = vld [vmem:[#allocation5] sm:$0x1f]   ;;  %v322_v3 = vld [vmem:[#allocation7] sm:$0xff]   ;;  %v61_v4 = vld [vmem:[#allocation2] sm:$0xf] }
  0x38   :  { %293 = vmatprep.subr.bf16.mxu1 %v433_v0  ;;  %309 = vmatprep.mubr.msk.bf16.mxu1 %vm434_vm0, %v433_v0  ;;  %v82_v2 = vsel %vm80_vm1, %v321_v1, 0  ;;  %v323_v5 = vld [vmem:[#allocation7 + $0x8] sm:$0xff]   ;;  %v324_v6 = vld [vmem:[#allocation7 + $0x10] sm:$0xff]   ;;  %v325_v7 = vld [vmem:[#allocation7 + $0x18] sm:$0xff]  }
  0x39   :  { %288 = vmatpush3.bf16.msra.mxu0 %v82_v2  ;;  %294 = vmatpush3.bf16.msra.mxu1 %v322_v3  ;;  %v326_v8 = vld [vmem:[#allocation7 + $0x20] sm:$0xff]   ;;  %v327_v9 = vld [vmem:[#allocation7 + $0x28] sm:$0xff]   ;;  %v328_v10 = vld [vmem:[#allocation7 + $0x30] sm:$0xff]  }
  0x3a   :  { %295 = vmatprep.subr.bf16.mxu1 %v433_v0  ;;  %v329_v11 = vld [vmem:[#allocation7 + $0x38] sm:$0xff]   ;;  %v264_v12 = vld [vmem:[%s530_s2] ss:$0 sm:$0xff]  ;;  %s435_s2 = smov [#allocation8]  }
  0x3b   :  { %v267_v20 = vld [vmem:[%s532_s4] ss:$0 sm:$0xff]  ;;  %s254_s7 = sshll.u32 %s435_s2, 4  ;;  %s255_s7 = int_to_ptr.vmem [resolvable:$true] %s254_s7 }
  0x3c   :  { %290 = vmatmul.mubr.msk.bf16.vlgmr.msra.gmra.mrb[0].mxu0 %vm76_vm2, %v61_v4  ;;  %s400_s4 = scalar_lea.vmem %s255_s7, 128  ;;  %p405_p11 = scmp.lt.s32.totalorder %s255_s7, %s255_s7 }
  0x3d   :  { %296 = vmatpush3.bf16.msra.mxu1 %v323_v5  ;;  %p401_p10 = scmp.ne.s32.totalorder %s255_s7, %s400_s4  ;;  %p406_p12 = scmp.lt.s32.totalorder %s400_s4, %s400_s4 }
  0x3e   :  { %297 = vmatprep.subr.bf16.mxu1 %v433_v0 }
  0x3f   :  { %p407_p13 = por %p406_p12, %p405_p11 }
  0x41   :  { %298 = vmatpush3.bf16.msra.mxu1 %v324_v6  ;;  %p408_p0 = pnand %p407_p13, %p401_p10 }
  0x42   :  { %299 = vmatprep.subr.bf16.mxu1 %v433_v0 }
  0x45   :  { %300 = vmatpush3.bf16.msra.mxu1 %v325_v7 }
  0x46   :  { %301 = vmatprep.subr.bf16.mxu1 %v433_v0 }
  0x49   :  { %302 = vmatpush3.bf16.msra.mxu1 %v326_v8 }
  0x4a   :  { %303 = vmatprep.subr.bf16.mxu1 %v433_v0 }
  0x4d   :  { %304 = vmatpush3.bf16.msra.mxu1 %v327_v9 }
  0x4e   :  { %305 = vmatprep.subr.bf16.mxu1 %v433_v0 }
  0x51   :  { %306 = vmatpush3.bf16.msra.mxu1 %v328_v10 }
  0x52   :  { %307 = vmatprep.subr.bf16.mxu1 %v433_v0 }
  0x55   :  { %308 = vmatpush3.bf16.msra.mxu1 %v329_v11 }
 0x10f   :  { %v118_v13 = vpop.f32.mrb[0].mxu0 }
 0x110   :  { %v119_v14 = vadd.f32 %v264_v12, %v118_v13  ;;  %v291_v15 = vpop.f32.mrb[1].mxu0 }
 0x111   :  { %v121_v16 = vpop.f32.mrb[2].mxu0 }
 0x112   :  { %v124_v17 = vmax.f32 %v119_v14, 0.0  ;;  %v292_v18 = vpop.f32.mrb[3].mxu0 }
 0x114   :  { %v125_v19 = vpack.c.bf16 %v124_v17, %v124_v17 }
 0x116   :  { %310 = vmatmul.mubr.bf16.vlgmr.msra.gmra.mrb[0].mxu1 %v125_v19 }
 0x1e9   :  { %v231_v21 = vpop.f32.mrb[0].mxu1 }
 0x1ea   :  { %v232_v22 = vadd.f32 %v267_v20, %v231_v21  ;;  %v311_v23 = vpop.f32.mrb[1].mxu1 }
 0x1eb   :  { %v234_v24 = vpop.f32.mrb[2].mxu1 }
 0x1ec   :  { %237 = vmax.xlane.f32.xlu0 %v232_v22  ;;  %v312_v25 = vpop.f32.mrb[3].mxu1 }
 0x279   :  { %v238_v26 = vpop.xlane.xlu0 %237 }
 0x27a   :  { %v239_v27 = vsub.f32 %v232_v22, %v238_v26 }
 0x27c   :  { %v240_v28 = vmul.f32 1.442695, %v239_v27 }
 0x27e   :  { %330 = vpow2.f32 %v240_v28 }
 0x288   :  { %v331_v29 = vpop.eup %330 }
 0x289   :  { %242 = vadd.xlane.f32.xlu0 %v331_v29 }
 0x316   :  { %v243_v30 = vpop.xlane.xlu0 %242 }
 0x317   :  { %332 = vrcp.f32 %v243_v30 }
 0x321   :  { %v333_v31 = vpop.eup %332 }
 0x322   :  { %v245_v32 = vmul.f32 %v333_v31, %v331_v29 }
 0x324   :  { %v246_v33 = vmul.f32 100.0, %v245_v32 }
 0x326   :  { %247 = vst.msk [vmem:[#allocation8] sm:$0xff] %vm76_vm2, %v246_v33 }
 0x327   :  { %411 = shalt.err (!%p408_p0)
}
 0x328   :  { %s412_s10 = scalar_lea.hbm %s533_s5, 128 }
 0x329   :  { %p413_p1 = scmp.ne.s32.totalorder %s533_s5, %s412_s10  ;;  %p416_p2 = scmp.lt.u32.totalorder %s412_s10, %s533_s5 }
 0x32b   :  { %p418_p3 = pnand %p416_p2, %p413_p1 }
 0x32d   :  { %421 = shalt.err (!%p418_p3)
}
 0x32e   :  { %257 = dma.vmem_to_hbm [thread:$0]  %s255_s7, 128, %s533_s5, [#allocation4]  }
 0x32f   :  { %426 = dma.done.wait [#allocation4], 128  }
 0x330   :  { %427 = vsyncadd [#allocation4], 4294967168 }
 0x331   :  { %261 = vsyncpa [#allocation3], 1 }
 0x332   :  { %262 = vsyncpa [#allocation6], 1 }
 0x333   :  { %263 = vsyncpa [#allocation4], 1 }

</bundles_post_ra>
